<compile_context>
chip_gen: v6e
topology: v6e:2x2x1
jax: 0.10.0
libtpu: 0.0.40
codegen_flags: <defaults>
</compile_context>

<pallas_src>
import functools

import jax
import jax.numpy as jnp
from jax.experimental import pallas as pl
from jax.experimental.pallas import tpu as pltpu


def _unfold_temporal_kernel(x_ref, o_ref, *, window_size, stride, dilation,
                            pad, T, V, L_t, lt_blk):
    """One grid step: all temporal windows for a block of (batch*channel) rows.

    x_ref : (B_blk, T, V)                 input tile (VMEM)
    o_ref : (B_blk, L_t, window_size * V) output tile (VMEM)
    """
    B = x_ref.shape[0]
    dt = o_ref.dtype
    # Static source-row shift per window: t = l*stride + shift, shift = w*dil - pad.
    shifts = [w * dilation - pad for w in range(window_size)]

    def read_rows(start, num):
        # In-bounds read of `num` source rows (one per output row) for a window.
        if stride == 1:
            return x_ref[:, pl.ds(start, num), :]
        return x_ref[:, pl.ds(start, num, stride), :]       # strided sublane read

    def cat_and_store(chunks, dst_slice):
        tile = chunks[0] if len(chunks) == 1 else jnp.concatenate(chunks, axis=-1)
        o_ref[:, dst_slice, :] = tile.astype(dt)

    def emit_static_subtile(l0, l1):
        # Boundary sub-tile [l0, l1): fully static starts; zero-padded rows are
        # supplied by a cheap sublane concat with zeros (no VMEM scratch).
        rows = l1 - l0
        chunks = []
        for s in shifts:
            v0 = max(l0, -(s // stride))                 # first valid output row
            v1 = min(l1, (T - 1 - s) // stride + 1)      # one past last valid row
            if v1 <= v0:
                chunks.append(jnp.zeros((B, rows, V), dt))
                continue
            seg = read_rows(v0 * stride + s, v1 - v0)    # static, in-bounds
            parts = []
            if v0 > l0:
                parts.append(jnp.zeros((B, v0 - l0, V), dt))
            parts.append(seg)
            if l1 > v1:
                parts.append(jnp.zeros((B, l1 - v1, V), dt))
            chunks.append(parts[0] if len(parts) == 1 else
                          jnp.concatenate(parts, axis=1))
        cat_and_store(chunks, slice(l0, l1))

    def emit_interior_subtile(j):
        # Interior sub-tile: every read is in range -> no masking, no padding.
        base = j * (lt_blk * stride)
        l0 = pl.multiple_of(j * lt_blk, lt_blk)
        chunks = [read_rows(base + s, lt_blk) for s in shifts]
        cat_and_store(chunks, pl.ds(l0, lt_blk))

    n_lt = -(-L_t // lt_blk)
    # Sub-tiles [0, j_lo) may touch the left zero-pad; [j_hi, n_lt) the right
    # pad / ragged tail; [j_lo, j_hi) are full, fully in-bounds sub-tiles.
    j_lo = -(-pad // (lt_blk * stride))
    hi_num = T - 1 - (lt_blk - 1) * stride - ((window_size - 1) * dilation - pad)
    j_hi = (hi_num // (lt_blk * stride)) + 1 if hi_num >= 0 else 0
    j_hi = min(j_hi, L_t // lt_blk)                      # full sub-tiles only
    j_lo = min(j_lo, n_lt)
    j_hi = min(max(j_hi, j_lo), n_lt)

    for j in range(j_lo):                                # static prologue
        emit_static_subtile(j * lt_blk, min(L_t, (j + 1) * lt_blk))
    if j_hi > j_lo:                                      # rolled interior loop
        pl.loop(j_lo, j_hi)(emit_interior_subtile)
    for j in range(j_hi, n_lt):                          # static epilogue
        emit_static_subtile(j * lt_blk, min(L_t, (j + 1) * lt_blk))


def _vmem_padded_bytes(rows, cols, dtype):
    """Rough VMEM footprint of a (rows, cols) trailing-dims tile (8/16/32 x 128)."""
    itemsize = jnp.dtype(dtype).itemsize
    sublane = 8 * max(1, 4 // itemsize)   # 8 (f32) / 16 (bf16) / 32 (int8)
    prows = -(-rows // sublane) * sublane
    pcols = -(-cols // 128) * 128
    return prows * pcols * itemsize


def unfold_temporal_window(x, window_size, window_stride, window_dilation=1,
                           *, lt_block=8, target_steps=8,
                           tile_budget_bytes=None, vmem_limit_bytes=None):
    """x: (N, C, T, V) -> (N, C, L_t, window_size * V)."""
    N, C, T, V = x.shape
    pad = ((window_size - 1) * window_dilation) // 2
    eff_ks = window_dilation * (window_size - 1) + 1
    L_t = (T + 2 * pad - eff_ks) // window_stride + 1
    assert L_t >= 1, "temporal window larger than padded sequence"

    NC = N * C
    x2 = x.reshape(NC, T, V)              # glue reshape: flatten batch*channel

    # Generation-aware VMEM budgets (v5e/v6e: 128 MiB physical, v7x: 64 MiB).
    if tile_budget_bytes is None or vmem_limit_bytes is None:
        try:
            phys = getattr(pltpu.get_tpu_info(), "vmem_capacity_bytes", None)
        except Exception:
            phys = None
        phys = phys or 64 * 1024 * 1024   # conservative (v7x-sized) fallback
        if vmem_limit_bytes is None:
            vmem_limit_bytes = max(32 * 1024 * 1024,
                                   min(3 * phys // 4, 96 * 1024 * 1024))
        if tile_budget_bytes is None:
            tile_budget_bytes = vmem_limit_bytes // 3

    # Rows per grid step from the VMEM budget: double-buffered in + out blocks
    # (no scratch any more).
    in_row = _vmem_padded_bytes(T, V, x.dtype)
    out_row = _vmem_padded_bytes(L_t, window_size * V, x.dtype)
    per_row = 2 * (in_row + out_row)
    b = max(1, tile_budget_bytes // per_row)
    if NC >= 2:
        # Keep >= ~target_steps grid steps so each v7x TensorCore gets several
        # steps and prefetch/writeback can overlap compute.
        b = min(b, max(1, -(-NC // target_steps)))
    b = max(1, min(b, NC))
    grid = (pl.cdiv(NC, b),)              # ragged last row-block is clipped

    kernel = functools.partial(
        _unfold_temporal_kernel,
        window_size=window_size, stride=window_stride, dilation=window_dilation,
        pad=pad, T=T, V=V, L_t=L_t, lt_blk=lt_block)

    out = pl.pallas_call(
        kernel,
        out_shape=jax.ShapeDtypeStruct((NC, L_t, window_size * V), x.dtype),
        grid=grid,
        in_specs=[pl.BlockSpec((b, T, V), lambda i: (i, 0, 0))],
        # If profiling shows exposed output writeback, sweep
        # pipeline_mode=pl.Buffered(3) on this out spec (after growing b).
        out_specs=pl.BlockSpec((b, L_t, window_size * V), lambda i: (i, 0, 0)),
        compiler_params=pltpu.CompilerParams(
            dimension_semantics=("parallel",),
            vmem_limit_bytes=vmem_limit_bytes),
    )(x2)

    return out.reshape(N, C, L_t, window_size * V)


def _reference(x, window_size, window_stride, window_dilation=1):
    """Pure-JAX reference reproducing torch.nn.Unfold + the module's permute."""
    N, C, T, V = x.shape
    pad = ((window_size - 1) * window_dilation) // 2
    eff_ks = window_dilation * (window_size - 1) + 1
    L_t = (T + 2 * pad - eff_ks) // window_stride + 1
    xp = jnp.pad(x, ((0, 0), (0, 0), (pad, pad), (0, 0)))
    t_idx = (jnp.arange(L_t)[:, None] * window_stride
             + jnp.arange(window_size)[None, :] * window_dilation)  # (L_t, ws)
    ref = xp[:, :, t_idx, :]                       # (N, C, L_t, ws, V)
    return ref.reshape(N, C, L_t, window_size * V)


if __name__ == "__main__":
    key = jax.random.PRNGKey(0)

    def check(xx, ws, st, dil):
        out = jax.block_until_ready(unfold_temporal_window(xx, ws, st, dil))
        ref = _reference(xx, ws, st, dil)
        assert out.shape == ref.shape, (out.shape, ref.shape)
        assert jnp.allclose(out.astype(jnp.float32),
                            ref.astype(jnp.float32)), (ws, st, dil, xx.dtype)

    # Canonical small shape from the module: (batch=2, channels=4, frames=16, verts=16).
    x_small = jax.random.normal(key, (2, 4, 16, 16), dtype=jnp.float32)
    for ws, st, dil in [(3, 1, 1), (3, 1, 2)]:
        check(x_small, ws, st, dil)

    # Larger frame count with a non-divisible batch*channel count: compiled
    # on-hardware coverage of the interior pl.loop, strided (stride>1) reads,
    # mixed stride/dilation, the ragged last row-block, and packed bf16.
    x_big = jax.random.normal(key, (3, 5, 64, 16), dtype=jnp.float32)
    for ws, st, dil in [(3, 1, 1), (3, 2, 1), (5, 2, 2)]:
        check(x_big, ws, st, dil)
    check(x_big.astype(jnp.bfloat16), 3, 1, 1)

    print("KERNEL_OK")
</pallas_src>

<mosaic_0001>
module attributes {stable_mosaic.version = 11 : i64} {
  func.func @_unfold_temporal_kernel(%arg0: i32, %arg1: memref<1x16x16xf32, #tpu.memory_space<vmem>>, %arg2: memref<1x16x48xf32, #tpu.memory_space<vmem>>) attributes {dimension_semantics = [#tpu.dimension_semantics<parallel>], iteration_bounds = array<i64: 8>, scalar_prefetch = 0 : i64, scratch_operands = 0 : i64, tpu.core_type = #tpu.core_type<tc>, window_params = [{transform_indices = @transform_0, window_bounds = array<i64: 1, 16, 16>}, {transform_indices = @transform_1, window_bounds = array<i64: 1, 16, 48>}]} {
    %c0 = arith.constant 0 : index
    %c0_0 = arith.constant 0 : index
    %c0_1 = arith.constant 0 : index
    %0 = vector.load %arg1[%c0, %c0_0, %c0_1] : memref<1x16x16xf32, #tpu.memory_space<vmem>>, vector<1x7x16xf32>
    %cst = arith.constant 0.000000e+00 : f32
    %1 = vector.broadcast %cst : f32 to vector<1x1x16xf32>
    %2 = tpu.concatenate %1, %0 in 1 : vector<1x1x16xf32>, vector<1x7x16xf32> -> vector<1x8x16xf32>
    %c0_2 = arith.constant 0 : index
    %c0_3 = arith.constant 0 : index
    %c0_4 = arith.constant 0 : index
    %3 = vector.load %arg1[%c0_2, %c0_3, %c0_4] : memref<1x16x16xf32, #tpu.memory_space<vmem>>, vector<1x8x16xf32>
    %c0_5 = arith.constant 0 : index
    %c1 = arith.constant 1 : index
    %c0_6 = arith.constant 0 : index
    %4 = vector.load %arg1[%c0_5, %c1, %c0_6] : memref<1x16x16xf32, #tpu.memory_space<vmem>>, vector<1x8x16xf32>
    %5 = tpu.concatenate %2, %3, %4 in 2 : vector<1x8x16xf32>, vector<1x8x16xf32>, vector<1x8x16xf32> -> vector<1x8x48xf32>
    %c0_7 = arith.constant 0 : index
    %c0_8 = arith.constant 0 : index
    %c0_9 = arith.constant 0 : index
    %6 = vector.load %arg2[%c0_7, %c0_8, %c0_9] : memref<1x16x48xf32, #tpu.memory_space<vmem>>, vector<1x8x48xf32>
    tpu.vector_store %arg2[%c0_7, %c0_8, %c0_9], %5 {strides = array<i32>} : memref<1x16x48xf32, #tpu.memory_space<vmem>>, vector<1x8x48xf32>,
    %c0_10 = arith.constant 0 : index
    %c7 = arith.constant 7 : index
    %c0_11 = arith.constant 0 : index
    %7 = vector.load %arg1[%c0_10, %c7, %c0_11] : memref<1x16x16xf32, #tpu.memory_space<vmem>>, vector<1x8x16xf32>
    %c0_12 = arith.constant 0 : index
    %c8 = arith.constant 8 : index
    %c0_13 = arith.constant 0 : index
    %8 = vector.load %arg1[%c0_12, %c8, %c0_13] : memref<1x16x16xf32, #tpu.memory_space<vmem>>, vector<1x8x16xf32>
    %c0_14 = arith.constant 0 : index
    %c9 = arith.constant 9 : index
    %c0_15 = arith.constant 0 : index
    %9 = vector.load %arg1[%c0_14, %c9, %c0_15] : memref<1x16x16xf32, #tpu.memory_space<vmem>>, vector<1x7x16xf32>
    %cst_16 = arith.constant 0.000000e+00 : f32
    %10 = vector.broadcast %cst_16 : f32 to vector<1x1x16xf32>
    %11 = tpu.concatenate %9, %10 in 1 : vector<1x7x16xf32>, vector<1x1x16xf32> -> vector<1x8x16xf32>
    %12 = tpu.concatenate %7, %8, %11 in 2 : vector<1x8x16xf32>, vector<1x8x16xf32>, vector<1x8x16xf32> -> vector<1x8x48xf32>
    %c0_17 = arith.constant 0 : index
    %c8_18 = arith.constant 8 : index
    %c0_19 = arith.constant 0 : index
    %13 = vector.load %arg2[%c0_17, %c8_18, %c0_19] : memref<1x16x48xf32, #tpu.memory_space<vmem>>, vector<1x8x48xf32>
    tpu.vector_store %arg2[%c0_17, %c8_18, %c0_19], %12 {strides = array<i32>} : memref<1x16x48xf32, #tpu.memory_space<vmem>>, vector<1x8x48xf32>,
    return
  }
  func.func @transform_0(%arg0: i32) -> (i32, i32, i32) {
    %c0_i32 = arith.constant 0 : i32
    %c0_i32_0 = arith.constant 0 : i32
    %c0_i32_1 = arith.constant 0 : i32
    return %arg0, %c0_i32, %c0_i32_0 : i32, i32, i32
  }
  func.func @transform_1(%arg0: i32) -> (i32, i32, i32) {
    %c0_i32 = arith.constant 0 : i32
    %c0_i32_0 = arith.constant 0 : i32
    %c0_i32_1 = arith.constant 0 : i32
    return %arg0, %c0_i32, %c0_i32_0 : i32, i32, i32
  }
}

</mosaic_0001>

<bundles_post_ra>
// kernel: tpu_custom_call.1
= control target key start
LH: loop header
LB: loop body
LE: loop exit
PB: predicated region body
PF: predicated region fallthrough
CT: control target
= control target key end

     0   :  { %6 = vsyncpa [#allocation3], 0  ;;  %s596_s0 = inlined_call_operand.hbm [shape: f32[8,16,16], index: 0, kind: input, shape index: {}]   ;;  %s597_s1 = inlined_call_operand.hbm [shape: f32[8,16,48], index: 1, kind: output, shape index: {}]  }
   0x1   :  { %8 = vsyncpa [#allocation3 + $0x1], 0 }
   0x2   :  { %9 = vsyncpa [#allocation4], 0 }
   0x3   :  { %11 = vsyncpa [#allocation4 + $0x1], 0  ;;  %s440_s6 = smov 0   ;;  %s442_s7 = smov 0  }
   0x4   :  { %s444_s8 = smov 0   ;;  %s446_s9 = smov 0  }
   0x5 LB: > { %s461_s10 = sadd.s32 4294967295, %s420_s9   ;;  %s260_s11 = sadd.s32 4294967294, %s420_s9   ;;  %s420_s9 = sphi %s446_s9, %s611_s9   ;;  %s416_s8 = sphi %s444_s8, %s610_s8   ;;  %s412_s7 = sphi %s442_s7, %s609_s7   ;;  %s408_s6 = sphi %s440_s6, %s608_s6  }
   0x6   : > { %s465_s12 = sadd.s32 1, %s420_s9   ;;  %s24_s13 = sadd.s32 1, %s416_s8 }
   0x7   : > { %s21_s14 = ssub.s32 %s420_s9, %s465_s12  ;;  %p31_p0 = scmp.ne.s32.totalorder %s416_s8, %s412_s7 }
   0x8   : > { %p22_p1 = scmp.eq.s32.totalorder %s21_s14, 0  ;;  %p32_p2 = scmp.eq.s32.totalorder %s420_s9, 0 }
   0x9   : > { %p37_p3 = scmp.ne.s32.totalorder %s412_s7, %s408_s6  ;;  %p38_p4 = scmp.eq.s32.totalorder %s461_s10, 0 }
   0xa   : > { %s477_s15 = scalar_select %p22_p1, %s416_s8, %s24_s13  }
   0xb   : > { %p479_p5 = por %p32_p2, %p31_p0  ;;  %p483_p6 = por %p38_p4, %p37_p3 }
   0xc   : > { %p61_p7 = scmp.eq.s32.totalorder %s461_s10, 7  ;;  %p67_p8 = scmp.eq.s32.totalorder %s260_s11, 7 }
   0xd   : > { %s601_s17 = scalar_select %p483_p6, 1, 0 }
   0xe   : > { %p288_p9 = scmp.lt.s32.totalorder %s420_s9, 8  ;;  %p489_p10 = por %p61_p7, %p31_p0 }
   0xf   : > { %p493_p11 = por %p67_p8, %p37_p3  ;;  %s87_s20 = sand.u32 1, %s416_s8  }
  0x10   : > { %s602_s18 = scalar_select %p489_p10, 1, 0 }
  0x11   : > { %s603_s19 = scalar_select %p493_p11, 1, 0 }
  0x12   : > { %s274_s21 = sshll.u32 %s420_s9, 8  ;;  %s263_s22 = sshll.u32 %s87_s20, 4 }
  0x13   : > { %s502_s25 = scalar_lea.hbm %s596_s0, %s274_s21  ;;  %s91_s26 = scalar_lea.vmem [#allocation2], %s263_s22 }
  0x14   : > { %s98_s27 = sshll.u32 %s91_s26, 4  ;;  %p506_p12 = pnand %p288_p9, %p479_p5  ;;  %s510_s27 = int_to_ptr.vmem [resolvable:$true] %s98_s27 }
  0x15   : > { %s512_s29 = scalar_lea.sflag [#allocation3], %s87_s20  ;;  %s328_s30 = scalar_lea.hbm %s502_s25, 256 }
  0x16   : > { %p329_p13 = scmp.ne.s32.totalorder %s502_s25, %s328_s30  ;;  %p330_p0 = pneg %p506_p12 }
  0x17   : > { %s333_s4 = scalar_lea.hbm %s596_s0, 2048  ;;  %p334_p3 = scmp.lt.s32.totalorder %s502_s25, %s596_s0 }
  0x18   : > { %p331_p1 = pnand %p330_p0, %p329_p13  ;;  %p335_p4 = scmp.lt.s32.totalorder %s333_s4, %s328_s30 }
  0x1a   : > { %p332_p2 = pneg %p331_p1  ;;  %p336_p5 = por %p335_p4, %p334_p3 }
  0x1c   : > { %p337_p7 = pnand %p336_p5, %p332_p2 }
  0x1e   : > { %340 = shalt.err (!%p337_p7)
}
  0x1f   : > { %s341_s13 = scalar_lea.vmem %s510_s27, 256  ;;  %s422_s14 = smov [#allocation2]  }
  0x20   : > { %p342_p8 = scmp.ne.s32.totalorder %s510_s27, %s341_s13  ;;  %s346_s16 = sshll.u32 %s422_s14, 4  ;;  %s347_s16 = int_to_ptr.vmem [resolvable:$false] %s346_s16 }
  0x21   : > { %s348_s20 = scalar_lea.vmem %s347_s16, 512  ;;  %p349_p1 = scmp.lt.s32.totalorder %s510_s27, %s347_s16 }
  0x22   : > { %p344_p9 = pnand %p342_p8, %p330_p0  ;;  %p350_p11 = scmp.lt.s32.totalorder %s348_s20, %s341_s13 }
  0x24   : > { %p345_p13 = pneg %p344_p9  ;;  %p351_p10 = por %p350_p11, %p349_p1 }
  0x26   : > { %p352_p6 = pnand %p351_p10, %p345_p13 }
  0x28   : > { %355 = shalt.err (!%p352_p6)
}
  0x29   : > { %s423_s21 = smov 128   ;;  %s424_s22 = smov 8  }
  0x2a   : > { %283 = dma.hbm_to_vmem [thread:$0]  (!%p506_p12), %s502_s25, 256, %s510_s27, %s512_s29, %s423_s21, %s423_s21, %s424_s22  }
  0x2b   : > { %p266_p0 = scmp.ge.s32.totalorder %s420_s9, 1  ;;  %p106_p2 = scmp.lt.s32.totalorder %s420_s9, 9 }
  0x2d   : > { %p107_p3 = pnand %p266_p0, %p106_p2 }
  0x2e   : > { %s536_s23 = sand.u32 (!%p107_p3), 1, %s412_s7   ;;  %p605_p6 = scmp.ne.s32.totalorder (!%p107_p3), %s601_s17, 0 }
  0x2f   : > { %110 = sbr.rel (%p107_p3) target bundleno = 189 (0xbd), region = 24  ;;  %s267_s24 = sshll.u32 (!%p107_p3), %s536_s23, 4 }
  0x30   : > { %s113_s26 = scalar_lea.sflag (!%p107_p3), [#allocation3], %s536_s23  ;;  %s116_s30 = scalar_lea.vmem (!%p107_p3), [#allocation2], %s267_s24 }
  0x34   : > { %399 = dma.done.wait (%p605_p6), %s113_s26, 256  }
  0x35   : > { %401 = vsyncadd (%p605_p6), %s113_s26, 4294967040  ;;  %vm160_vm0 = vcmask 1046528   ;;  %v141_v0 = vld [vmem:[%s116_s30] sm:$0xff]  ;;  %s425_s25 = smov 16   ;;  %s426_s27 = smov 32   ;;  %v158_v3 = vld [vmem:[%s116_s30 + $0x8] sm:$0xff] }
  0x36   : > { %v142_v1 = vld [vmem:[%s116_s30 + $0x1] sm:$0xff]  ;;  %144 = vrot.lane.b32.xlu0 %v141_v0, %s425_s25  ;;  %v159_v2 = vld [vmem:[%s116_s30 + $0x9] sm:$0x7f]  ;;  %vm139_vm1 = vcmask 1040384   ;;  %vm151_vm2 = vcmask 130048   ;;  %vm153_vm3 = vcmask 261120  }
  0x37   : > { %148 = vrot.lane.b32.xlu1 %v142_v1, %s426_s27  ;;  %v161_v4 = vsel %vm160_vm0, %v159_v2, 0.0  ;;  %v135_v5 = vld [vmem:[%s116_s30] sm:$0x7f]  ;;  %vm155_vm4 = vcmask 392192   ;;  %s134_s17 = scalar_lea.vmem [#allocation5], %s267_s24  ;;  %s275_s29 = sshll.u32 %s461_s10, 8 }
  0x38   : > { %v137_v6 = vrot.slane %v135_v5, 7  ;;  %s187_s28 = sshll.u32 %s134_s17, 4  ;;  %v157_v12 = vld [vmem:[%s116_s30 + $0x7] sm:$0xff]  ;;  %s552_s4 = scalar_lea.hbm %s597_s1, %s275_s29  ;;  %s547_s28 = int_to_ptr.vmem [resolvable:$true] %s187_s28 }
  0x39   : > { %s174_s10 = scalar_lea.sflag [#allocation4], %s536_s23  ;;  %s356_s5 = scalar_lea.vmem %s547_s28, 256 }
  0x3a   : > { %163 = vrot.lane.b32.xlu0 %v158_v3, %s425_s25  ;;  %v140_v7 = vsel %vm139_vm1, 0.0, %v137_v6  ;;  %p357_p10 = scmp.ne.s32.totalorder %s547_s28, %s356_s5  ;;  %p606_p11 = scmp.ne.s32.totalorder %s602_s18, 0 }
  0x3b   : > { %167 = vrot.lane.b32.xlu1 %v161_v4, %s426_s27  ;;  %s427_s11 = smov [#allocation5]  }
  0x3c   : > { %p358_p12 = pnand %p357_p10, %p606_p11  ;;  %s360_s13 = sshll.u32 %s427_s11, 4  ;;  %s361_s13 = int_to_ptr.vmem [resolvable:$false] %s360_s13 }
  0x3d   : > { %s362_s14 = scalar_lea.vmem %s361_s13, 512  ;;  %p363_p5 = scmp.lt.s32.totalorder %s547_s28, %s361_s13 }
  0x3e   : > { %p359_p4 = pneg %p358_p12  ;;  %p364_p7 = scmp.lt.s32.totalorder %s362_s14, %s356_s5 }
  0x40   : > { %p365_p8 = por %p364_p7, %p363_p5 }
  0x42   : > { %p366_p9 = pnand %p365_p8, %p359_p4 }
  0xa8   : > { %v145_v8 = vpop.permute.xlu0 %144 }
  0xa9   : > { %v149_v9 = vpop.permute.xlu1 %148  ;;  %v152_v10 = vsel %vm151_vm2, %v140_v7, %v145_v8 }
  0xaa   : > { %v154_v11 = vsel %vm153_vm3, %v152_v10, %v149_v9 }
  0xab   : > { %156 = vst.msk [vmem:[%s134_s17] sm:$0xff] %vm155_vm4, %v154_v11 }
  0xac   : > { %v164_v13 = vpop.permute.xlu0 %163 }
  0xad   : > { %v168_v14 = vpop.permute.xlu1 %167  ;;  %v170_v15 = vsel %vm151_vm2, %v157_v12, %v164_v13 }
  0xae   : > { %v171_v16 = vsel %vm153_vm3, %v170_v15, %v168_v14 }
  0xaf   : > { %172 = vst.msk [vmem:[%s134_s17 + $0x8] sm:$0xff] %vm155_vm4, %v171_v16 }
  0xb0   : > { %369 = shalt.err (!%p366_p9)
}
  0xb1   : > { %s370_s16 = scalar_lea.hbm %s552_s4, 256  ;;  %s374_s22 = scalar_lea.hbm %s597_s1, 2048 }
  0xb2   : > { %p371_p13 = scmp.ne.s32.totalorder %s552_s4, %s370_s16  ;;  %p375_p2 = scmp.lt.s32.totalorder %s552_s4, %s597_s1 }
  0xb3   : > { %p376_p3 = scmp.lt.s32.totalorder %s374_s22, %s370_s16 }
  0xb4   : > { %p372_p1 = pnand %p371_p13, %p606_p11 }
  0xb5   : > { %p377_p6 = por %p376_p3, %p375_p2 }
  0xb6   : > { %p373_p0 = pneg %p372_p1 }
  0xb8   : > { %p378_p10 = pnand %p377_p6, %p373_p0 }
  0xba   : > { %381 = shalt.err (!%p378_p10)
}
  0xbb   : > { %s428_s30 = smov 128   ;;  %s429_s25 = smov 8  }
  0xbc   : > { %278 = dma.vmem_to_hbm [thread:$0]  (%p606_p11), %s547_s28, 256, %s552_s4, %s174_s10, %s428_s30, %s428_s30, %s429_s25  }
  0xbd PF: > { %p289_p12 = scmp.ge.s32.totalorder %s420_s9, 2  ;;  %s202_s27 = sand.u32 1, %s408_s6  }
  0xbe   : > { %p607_p4 = scmp.ne.s32.totalorder %s603_s19, 0  ;;  %s203_s17 = scalar_lea.sflag [#allocation4], %s202_s27 }
  0xc0   : > { %p285_p5 = pnand %p289_p12, %p607_p4 }
  0xc2   : > { %p286_p7 = pneg %p285_p5 }
  0xc4   : > { %403 = dma.done.wait (%p286_p7), %s203_s17, 256  }
  0xc5   : > { %405 = vsyncadd (%p286_p7), %s203_s17, 4294967040  ;;  %p14_p8 = scmp.ge.s32.totalorder %s465_s12, 10   ;;  %s608_s6 = smov %s412_s7 }
  0xc6   : > { %s609_s7 = smov %s416_s8  ;;  %s610_s8 = smov %s477_s15 }
  0xc7   : > { %s611_s9 = smov %s465_s12  ;;  %16 = sbr.rel (!%p14_p8) target bundleno = 5 (0x5), region = 69 }
  0xcc   :  { %208 = vsyncpa [#allocation3], 1 }
  0xcd   :  { %210 = vsyncpa [#allocation3 + $0x1], 1 }
  0xce   :  { %211 = vsyncpa [#allocation4], 1 }
  0xcf   :  { %213 = vsyncpa [#allocation4 + $0x1], 1 }

</bundles_post_ra>
